<compile_context>
chip_gen: v6e
topology: v6e:2x2x1
jax: 0.10.0
libtpu: 0.0.40
codegen_flags: <defaults>
</compile_context>

<pallas_src>
import math

import jax
import jax.numpy as jnp
from jax.experimental import pallas as pl
from jax.experimental.pallas import tpu as pltpu


_LEAKY_SLOPE = 0.01  # nn.LeakyReLU() default


def _leaky_relu(x, slope=_LEAKY_SLOPE):
    return jnp.where(x > 0, x, slope * x)


def actor_critic_kernel(
    state_ref, action_ref,
    w1_ref, b1_ref, w2_ref, b2_ref, w3_ref, b3_ref,
    inv2v_ref, lbias_ref, amask_ref,
    out_ref,
):
    """One (TB, ...) batch tile of the fused actor+critic evaluate().

    state_ref : (TB, S)     bf16
    action_ref: (TB, A+1)   f32   (last column is zero padding)
    w1 (S, H)  bf16, b1 (1, H) f32         H = actor_hidden + critic_hidden
    w2 (H, H)  bf16 (block-diag), b2 (1, H) f32
    w3 (H, A+1) bf16 (block-diag), b3 (1, A+1) f32
    inv2v/lbias/amask : (1, A+1) f32 per-action constants / actor-column mask
    out_ref   : (TB, A+1)   f32   cols [0:A) = log_prob, col A = state value
    """
    x = state_ref[...]                                                  # bf16

    # fused actor|critic hidden layers: bf16 operands, f32 accumulation
    h = jnp.dot(x, w1_ref[...], preferred_element_type=jnp.float32) + b1_ref[...]
    h = _leaky_relu(h)
    h = jnp.dot(h.astype(jnp.bfloat16), w2_ref[...],
                preferred_element_type=jnp.float32) + b2_ref[...]
    h = _leaky_relu(h)

    # fused block-diagonal heads -> (TB, A+1): actor pre-tanh | critic value
    z = jnp.dot(h.astype(jnp.bfloat16), w3_ref[...],
                preferred_element_type=jnp.float32) + b3_ref[...]

    mean = jnp.tanh(z)                      # only actor columns are kept below
    a = action_ref[...]
    diff = a - mean
    logp = -(diff * diff) * inv2v_ref[...] + lbias_ref[...]

    # actor columns -> log_prob, value column -> raw linear output
    out_ref[...] = jnp.where(amask_ref[...] > 0.5, logp, z)


def _fuse_params(params):
    """Pack actor+critic into block-diagonal fused weights + logp constants."""
    A = params["w3a"].shape[1]

    w1 = jnp.concatenate([params["w1a"], params["w1c"]], axis=1)
    b1 = jnp.concatenate([params["b1a"], params["b1c"]], axis=1)
    w2 = jax.scipy.linalg.block_diag(params["w2a"], params["w2c"])
    b2 = jnp.concatenate([params["b2a"], params["b2c"]], axis=1)
    w3 = jax.scipy.linalg.block_diag(params["w3a"], params["w3c"])      # (H, A+1)
    b3 = jnp.concatenate([params["b3a"], params["b3c"]], axis=1)        # (1, A+1)

    log_std = params["log_std"]                                         # (1, A)
    half_log2pi = jnp.float32(0.5 * math.log(2.0 * math.pi))
    inv2v = 0.5 * jnp.exp(-2.0 * log_std)                               # 1/(2 var)
    lbias = -log_std - half_log2pi

    pad1 = lambda v: jnp.pad(v, ((0, 0), (0, 1)))                       # add value col
    amask = jnp.concatenate(
        [jnp.ones((1, A), jnp.float32), jnp.zeros((1, 1), jnp.float32)], axis=1)
    return w1, b1, w2, b2, w3, b3, pad1(inv2v), pad1(lbias), amask


def actor_critic_evaluate(state, action, params, *, tile_b=1024):
    """Returns (action_logprobs (B,A), state_values (B,1), dist_entropy (B,A))."""
    B, S = state.shape
    A = action.shape[1]
    w1, b1, w2, b2, w3, b3, inv2v, lbias, amask = _fuse_params(params)
    H = w1.shape[1]

    # batch tile: sublane-aligned, capped so double-buffered tiles fit v7x VMEM too
    def _round_up(x, m):
        return (x + m - 1) // m * m

    TB = min(tile_b, _round_up(B, 8))
    B_pad = _round_up(B, TB)
    nb = B_pad // TB

    state_p = jnp.pad(state, ((0, B_pad - B), (0, 0))).astype(jnp.bfloat16)
    action_p = jnp.pad(action, ((0, B_pad - B), (0, 1)))  # batch pad + zero value col

    w1 = w1.astype(jnp.bfloat16)
    w2 = w2.astype(jnp.bfloat16)
    w3 = w3.astype(jnp.bfloat16)

    def const(shape):
        return pl.BlockSpec(shape, lambda i: (0, 0))      # resident across grid

    grid_spec = pltpu.PrefetchScalarGridSpec(
        num_scalar_prefetch=0,
        grid=(nb,),
        in_specs=[
            pl.BlockSpec((TB, S), lambda i: (i, 0)),       # state tile
            pl.BlockSpec((TB, A + 1), lambda i: (i, 0)),   # action tile (padded)
            const((S, H)), const((1, H)),
            const((H, H)), const((1, H)),
            const((H, A + 1)), const((1, A + 1)),
            const((1, A + 1)), const((1, A + 1)), const((1, A + 1)),
        ],
        out_specs=pl.BlockSpec((TB, A + 1), lambda i: (i, 0)),
    )

    out = pl.pallas_call(
        actor_critic_kernel,
        out_shape=jax.ShapeDtypeStruct((B_pad, A + 1), jnp.float32),
        grid_spec=grid_spec,
        compiler_params=pltpu.CompilerParams(
            dimension_semantics=("parallel",),             # v7x: 2 TCs split the grid
            vmem_limit_bytes=32 * 1024 * 1024,             # explicit, safe on v5e/v6e/v7x
        ),
    )(state_p, action_p, w1, b1, w2, b2, w3, b3, inv2v, lbias, amask)

    out = out[:B]
    logp = out[:, :A]
    value = out[:, A:A + 1]
    # entropy depends only on log_std -> computed here, no redundant HBM traffic
    half_log2pi = 0.5 * math.log(2.0 * math.pi)
    ent = jnp.broadcast_to(0.5 + half_log2pi + params["log_std"], (B, A))
    return logp, value, ent


def make_params(key, state_dim, action_dim, actor_hidden, critic_hidden, action_std=0.6):
    keys = jax.random.split(key, 8)
    gain = math.sqrt(2.0 / (1.0 + 0.01 ** 2))  # calculate_gain('leaky_relu')
    ortho = jax.nn.initializers.orthogonal(scale=gain)

    def lin(k, din, dout, init):
        w = init(k, (din, dout), jnp.float32)
        b = jnp.zeros((1, dout), jnp.float32)
        return w, b

    # actor (orthogonal init, zero bias)
    w1a, b1a = lin(keys[0], state_dim, actor_hidden, ortho)
    w2a, b2a = lin(keys[1], actor_hidden, actor_hidden, ortho)
    w3a, b3a = lin(keys[2], actor_hidden, action_dim, ortho)

    # critic (PyTorch default-style uniform init)
    def default_init(k, shape, dtype):
        bound = 1.0 / math.sqrt(shape[0])
        return jax.random.uniform(k, shape, dtype, -bound, bound)

    w1c, b1c = lin(keys[3], state_dim, critic_hidden, default_init)
    w2c, b2c = lin(keys[4], critic_hidden, critic_hidden, default_init)
    w3c, b3c = lin(keys[5], critic_hidden, 1, default_init)

    # log_action_std = rand(action_dim)/100 + action_std
    log_std = (jax.random.uniform(keys[6], (1, action_dim), jnp.float32) / 100.0
               + jnp.float32(action_std))

    return dict(
        w1a=w1a, b1a=b1a, w2a=w2a, b2a=b2a, w3a=w3a, b3a=b3a,
        w1c=w1c, b1c=b1c, w2c=w2c, b2c=b2c, w3c=w3c, b3c=b3c,
        log_std=log_std,
    )


def _reference_evaluate(state, action, p):
    """Pure-JAX f32 reference of the same module math."""
    def leaky(x):
        return jnp.where(x > 0, x, 0.01 * x)
    h = leaky(state @ p["w1a"] + p["b1a"])
    h = leaky(h @ p["w2a"] + p["b2a"])
    mean = jnp.tanh(h @ p["w3a"] + p["b3a"])
    log_std = p["log_std"]
    std = jnp.exp(log_std)
    half_log2pi = 0.5 * math.log(2.0 * math.pi)
    logp = -((action - mean) ** 2) / (2.0 * std * std) - log_std - half_log2pi
    ent = jnp.broadcast_to(0.5 + half_log2pi + log_std, action.shape)
    c = leaky(state @ p["w1c"] + p["b1c"])
    c = leaky(c @ p["w2c"] + p["b2c"])
    val = c @ p["w3c"] + p["b3c"]
    return logp, val, ent


if __name__ == "__main__":
    # Small shapes consistent with the module: state_dim=16, hidden=32, action_dim=4, batch=8.
    B, state_dim, action_dim, actor_hidden, critic_hidden = 8, 16, 4, 32, 32

    key = jax.random.PRNGKey(0)
    k_state, k_action, k_params = jax.random.split(key, 3)
    state = jax.random.normal(k_state, (B, state_dim), jnp.float32)
    action = jax.random.normal(k_action, (B, action_dim), jnp.float32)
    params = make_params(k_params, state_dim, action_dim, actor_hidden, critic_hidden)

    logp, value, ent = actor_critic_evaluate(state, action, params)
    jax.block_until_ready((logp, value, ent))

    # Correctness vs. pure-JAX f32 reference (matmul operands are bf16 in-kernel,
    # accumulation f32 -> loose-ish tolerance on logp / value, entropy is exact math).
    r_logp, r_value, r_ent = _reference_evaluate(state, action, params)
    assert logp.shape == (B, action_dim) and value.shape == (B, 1) and ent.shape == (B, action_dim)
    assert jnp.allclose(logp, r_logp, atol=3e-2, rtol=3e-2)
    assert jnp.allclose(value, r_value, atol=3e-2, rtol=3e-2)
    assert jnp.allclose(ent, r_ent, atol=1e-6, rtol=1e-6)

    # TODO(synk): the stochastic `act()` path (Normal.sample) is not implemented
    # in-kernel; it would need pltpu.prng_seed / pltpu.stateful_normal.
    print("KERNEL_OK")
</pallas_src>

<mosaic_0001>
module attributes {stable_mosaic.version = 11 : i64} {
  func.func @actor_critic_kernel(%arg0: i32, %arg1: memref<8x16xbf16, #tpu.memory_space<vmem>>, %arg2: memref<8x5xf32, #tpu.memory_space<vmem>>, %arg3: memref<16x64xbf16, #tpu.memory_space<vmem>>, %arg4: memref<1x64xf32, #tpu.memory_space<vmem>>, %arg5: memref<64x64xbf16, #tpu.memory_space<vmem>>, %arg6: memref<1x64xf32, #tpu.memory_space<vmem>>, %arg7: memref<64x5xbf16, #tpu.memory_space<vmem>>, %arg8: memref<1x5xf32, #tpu.memory_space<vmem>>, %arg9: memref<1x5xf32, #tpu.memory_space<vmem>>, %arg10: memref<1x5xf32, #tpu.memory_space<vmem>>, %arg11: memref<1x5xf32, #tpu.memory_space<vmem>>, %arg12: memref<8x5xf32, #tpu.memory_space<vmem>>) attributes {dimension_semantics = [#tpu.dimension_semantics<parallel>], iteration_bounds = array<i64: 1>, scalar_prefetch = 0 : i64, scratch_operands = 0 : i64, tpu.core_type = #tpu.core_type<tc>, window_params = [{transform_indices = @transform_0, window_bounds = array<i64: 8, 16>}, {transform_indices = @transform_1, window_bounds = array<i64: 8, 5>}, {pipeline_mode = #tpu.pipeline_mode<synchronous>, transform_indices = @transform_2, window_bounds = array<i64: 16, 64>}, {pipeline_mode = #tpu.pipeline_mode<synchronous>, transform_indices = @transform_3, window_bounds = array<i64: 1, 64>}, {pipeline_mode = #tpu.pipeline_mode<synchronous>, transform_indices = @transform_4, window_bounds = array<i64: 64, 64>}, {pipeline_mode = #tpu.pipeline_mode<synchronous>, transform_indices = @transform_5, window_bounds = array<i64: 1, 64>}, {pipeline_mode = #tpu.pipeline_mode<synchronous>, transform_indices = @transform_6, window_bounds = array<i64: 64, 5>}, {pipeline_mode = #tpu.pipeline_mode<synchronous>, transform_indices = @transform_7, window_bounds = array<i64: 1, 5>}, {pipeline_mode = #tpu.pipeline_mode<synchronous>, transform_indices = @transform_8, window_bounds = array<i64: 1, 5>}, {pipeline_mode = #tpu.pipeline_mode<synchronous>, transform_indices = @transform_9, window_bounds = array<i64: 1, 5>}, {pipeline_mode = #tpu.pipeline_mode<synchronous>, transform_indices = @transform_10, window_bounds = array<i64: 1, 5>}, {transform_indices = @transform_11, window_bounds = array<i64: 8, 5>}]} {
    %c0 = arith.constant 0 : index
    %c0_0 = arith.constant 0 : index
    %0 = vector.load %arg1[%c0, %c0_0] : memref<8x16xbf16, #tpu.memory_space<vmem>>, vector<8x16xbf16>
    %c0_1 = arith.constant 0 : index
    %c0_2 = arith.constant 0 : index
    %1 = vector.load %arg3[%c0_1, %c0_2] : memref<16x64xbf16, #tpu.memory_space<vmem>>, vector<16x64xbf16>
    %cst = arith.constant dense<0.000000e+00> : vector<8x64xf32>
    %2 = tpu.matmul %0, %1, %cst {dimension_numbers = #tpu.dot_dimension_numbers<[1], [0], [0], [1], [0, 0, 1, 1], [], []>} : vector<8x16xbf16>, vector<16x64xbf16>, vector<8x64xf32> -> vector<8x64xf32>
    %c0_3 = arith.constant 0 : index
    %c0_4 = arith.constant 0 : index
    %3 = vector.load %arg4[%c0_3, %c0_4] : memref<1x64xf32, #tpu.memory_space<vmem>>, vector<1x64xf32>
    %4 = vector.broadcast %3 : vector<1x64xf32> to vector<8x64xf32>
    %5 = arith.addf %2, %4 : vector<8x64xf32>
    %cst_5 = arith.constant 0.000000e+00 : f32
    %6 = vector.broadcast %cst_5 : f32 to vector<8x64xf32>
    %7 = arith.cmpf ogt, %5, %6 : vector<8x64xf32>
    %cst_6 = arith.constant 0.00999999977 : f32
    %8 = vector.broadcast %cst_6 : f32 to vector<8x64xf32>
    %9 = arith.mulf %8, %5 : vector<8x64xf32>
    %10 = arith.select %7, %5, %9 : vector<8x64xi1>, vector<8x64xf32>
    %11 = arith.truncf %10 : vector<8x64xf32> to vector<8x64xbf16>
    %c0_7 = arith.constant 0 : index
    %c0_8 = arith.constant 0 : index
    %12 = vector.load %arg5[%c0_7, %c0_8] : memref<64x64xbf16, #tpu.memory_space<vmem>>, vector<64x64xbf16>
    %cst_9 = arith.constant dense<0.000000e+00> : vector<8x64xf32>
    %13 = tpu.matmul %11, %12, %cst_9 {dimension_numbers = #tpu.dot_dimension_numbers<[1], [0], [0], [1], [0, 0, 1, 1], [], []>} : vector<8x64xbf16>, vector<64x64xbf16>, vector<8x64xf32> -> vector<8x64xf32>
    %c0_10 = arith.constant 0 : index
    %c0_11 = arith.constant 0 : index
    %14 = vector.load %arg6[%c0_10, %c0_11] : memref<1x64xf32, #tpu.memory_space<vmem>>, vector<1x64xf32>
    %15 = vector.broadcast %14 : vector<1x64xf32> to vector<8x64xf32>
    %16 = arith.addf %13, %15 : vector<8x64xf32>
    %cst_12 = arith.constant 0.000000e+00 : f32
    %17 = vector.broadcast %cst_12 : f32 to vector<8x64xf32>
    %18 = arith.cmpf ogt, %16, %17 : vector<8x64xf32>
    %cst_13 = arith.constant 0.00999999977 : f32
    %19 = vector.broadcast %cst_13 : f32 to vector<8x64xf32>
    %20 = arith.mulf %19, %16 : vector<8x64xf32>
    %21 = arith.select %18, %16, %20 : vector<8x64xi1>, vector<8x64xf32>
    %22 = arith.truncf %21 : vector<8x64xf32> to vector<8x64xbf16>
    %c0_14 = arith.constant 0 : index
    %c0_15 = arith.constant 0 : index
    %23 = vector.load %arg7[%c0_14, %c0_15] : memref<64x5xbf16, #tpu.memory_space<vmem>>, vector<64x5xbf16>
    %cst_16 = arith.constant dense<0.000000e+00> : vector<8x5xf32>
    %24 = tpu.matmul %22, %23, %cst_16 {dimension_numbers = #tpu.dot_dimension_numbers<[1], [0], [0], [1], [0, 0, 1, 1], [], []>} : vector<8x64xbf16>, vector<64x5xbf16>, vector<8x5xf32> -> vector<8x5xf32>
    %c0_17 = arith.constant 0 : index
    %c0_18 = arith.constant 0 : index
    %25 = vector.load %arg8[%c0_17, %c0_18] : memref<1x5xf32, #tpu.memory_space<vmem>>, vector<1x5xf32>
    %26 = vector.broadcast %25 : vector<1x5xf32> to vector<8x5xf32>
    %27 = arith.addf %24, %26 : vector<8x5xf32>
    %28 = math.tanh %27 : vector<8x5xf32>
    %c0_19 = arith.constant 0 : index
    %c0_20 = arith.constant 0 : index
    %29 = vector.load %arg2[%c0_19, %c0_20] : memref<8x5xf32, #tpu.memory_space<vmem>>, vector<8x5xf32>
    %30 = arith.subf %29, %28 : vector<8x5xf32>
    %31 = arith.mulf %30, %30 : vector<8x5xf32>
    %cst_21 = arith.constant 0.000000e+00 : f32
    %32 = vector.broadcast %cst_21 : f32 to vector<8x5xf32>
    %33 = arith.subf %32, %31 : vector<8x5xf32>
    %c0_22 = arith.constant 0 : index
    %c0_23 = arith.constant 0 : index
    %34 = vector.load %arg9[%c0_22, %c0_23] : memref<1x5xf32, #tpu.memory_space<vmem>>, vector<1x5xf32>
    %35 = vector.broadcast %34 : vector<1x5xf32> to vector<8x5xf32>
    %36 = arith.mulf %33, %35 : vector<8x5xf32>
    %c0_24 = arith.constant 0 : index
    %c0_25 = arith.constant 0 : index
    %37 = vector.load %arg10[%c0_24, %c0_25] : memref<1x5xf32, #tpu.memory_space<vmem>>, vector<1x5xf32>
    %38 = vector.broadcast %37 : vector<1x5xf32> to vector<8x5xf32>
    %39 = arith.addf %36, %38 : vector<8x5xf32>
    %c0_26 = arith.constant 0 : index
    %c0_27 = arith.constant 0 : index
    %40 = vector.load %arg11[%c0_26, %c0_27] : memref<1x5xf32, #tpu.memory_space<vmem>>, vector<1x5xf32>
    %cst_28 = arith.constant 5.000000e-01 : f32
    %41 = vector.broadcast %cst_28 : f32 to vector<1x5xf32>
    %42 = arith.cmpf ogt, %40, %41 : vector<1x5xf32>
    %43 = vector.shape_cast %42 : vector<1x5xi1> to vector<1x5xi1>
    %44 = vector.broadcast %43 : vector<1x5xi1> to vector<8x5xi1>
    %45 = arith.select %44, %39, %27 : vector<8x5xi1>, vector<8x5xf32>
    %c0_29 = arith.constant 0 : index
    %c0_30 = arith.constant 0 : index
    %46 = vector.load %arg12[%c0_29, %c0_30] : memref<8x5xf32, #tpu.memory_space<vmem>>, vector<8x5xf32>
    tpu.vector_store %arg12[%c0_29, %c0_30], %45 {strides = array<i32>} : memref<8x5xf32, #tpu.memory_space<vmem>>, vector<8x5xf32>,
    return
  }
  func.func @transform_0(%arg0: i32) -> (i32, i32) {
    %c0_i32 = arith.constant 0 : i32
    %c0_i32_0 = arith.constant 0 : i32
    return %arg0, %c0_i32 : i32, i32
  }
  func.func @transform_1(%arg0: i32) -> (i32, i32) {
    %c0_i32 = arith.constant 0 : i32
    %c0_i32_0 = arith.constant 0 : i32
    return %arg0, %c0_i32 : i32, i32
  }
  func.func @transform_2(%arg0: i32) -> (i32, i32) {
    %c0_i32 = arith.constant 0 : i32
    %c0_i32_0 = arith.constant 0 : i32
    %c0_i32_1 = arith.constant 0 : i32
    return %c0_i32, %c0_i32_0 : i32, i32
  }
  func.func @transform_3(%arg0: i32) -> (i32, i32) {
    %c0_i32 = arith.constant 0 : i32
    %c0_i32_0 = arith.constant 0 : i32
    %c0_i32_1 = arith.constant 0 : i32
    return %c0_i32, %c0_i32_0 : i32, i32
  }
  func.func @transform_4(%arg0: i32) -> (i32, i32) {
    %c0_i32 = arith.constant 0 : i32
    %c0_i32_0 = arith.constant 0 : i32
    %c0_i32_1 = arith.constant 0 : i32
    return %c0_i32, %c0_i32_0 : i32, i32
  }
  func.func @transform_5(%arg0: i32) -> (i32, i32) {
    %c0_i32 = arith.constant 0 : i32
    %c0_i32_0 = arith.constant 0 : i32
    %c0_i32_1 = arith.constant 0 : i32
    return %c0_i32, %c0_i32_0 : i32, i32
  }
  func.func @transform_6(%arg0: i32) -> (i32, i32) {
    %c0_i32 = arith.constant 0 : i32
    %c0_i32_0 = arith.constant 0 : i32
    %c0_i32_1 = arith.constant 0 : i32
    return %c0_i32, %c0_i32_0 : i32, i32
  }
  func.func @transform_7(%arg0: i32) -> (i32, i32) {
    %c0_i32 = arith.constant 0 : i32
    %c0_i32_0 = arith.constant 0 : i32
    %c0_i32_1 = arith.constant 0 : i32
    return %c0_i32, %c0_i32_0 : i32, i32
  }
  func.func @transform_8(%arg0: i32) -> (i32, i32) {
    %c0_i32 = arith.constant 0 : i32
    %c0_i32_0 = arith.constant 0 : i32
    %c0_i32_1 = arith.constant 0 : i32
    return %c0_i32, %c0_i32_0 : i32, i32
  }
  func.func @transform_9(%arg0: i32) -> (i32, i32) {
    %c0_i32 = arith.constant 0 : i32
    %c0_i32_0 = arith.constant 0 : i32
    %c0_i32_1 = arith.constant 0 : i32
    return %c0_i32, %c0_i32_0 : i32, i32
  }
  func.func @transform_10(%arg0: i32) -> (i32, i32) {
    %c0_i32 = arith.constant 0 : i32
    %c0_i32_0 = arith.constant 0 : i32
    %c0_i32_1 = arith.constant 0 : i32
    return %c0_i32, %c0_i32_0 : i32, i32
  }
  func.func @transform_11(%arg0: i32) -> (i32, i32) {
    %c0_i32 = arith.constant 0 : i32
    %c0_i32_0 = arith.constant 0 : i32
    return %arg0, %c0_i32 : i32, i32
  }
}

</mosaic_0001>

<bundles_post_ra>
// kernel: tpu_custom_call.1
= control target key start
LH: loop header
LB: loop body
LE: loop exit
PB: predicated region body
PF: predicated region fallthrough
CT: control target
= control target key end

     0   :  { %16 = vsyncpa [#allocation3], 0  ;;  %s648_s0 = inlined_call_operand.hbm [shape: bf16[8,16], index: 0, kind: input, shape index: {}]   ;;  %s649_s1 = inlined_call_operand.vmem [shape: f32[8,5], index: 1, kind: input, shape index: {}]   ;;  %s650_s2 = inlined_call_operand.hbm [shape: bf16[16,64], index: 2, kind: input, shape index: {}]   ;;  %s651_s3 = inlined_call_operand.vmem [shape: f32[1,64], index: 3, kind: input, shape index: {}]   ;;  %s652_s4 = inlined_call_operand.vmem [shape: bf16[64,64], index: 4, kind: input, shape index: {}]   ;;  %s653_s5 = inlined_call_operand.hbm [shape: f32[1,64], index: 5, kind: input, shape index: {}]   ;;  %s654_s6 = inlined_call_operand.vmem [shape: bf16[64,5], index: 6, kind: input, shape index: {}]   ;;  %s655_s7 = inlined_call_operand.vmem [shape: f32[1,5], index: 7, kind: input, shape index: {}]   ;;  %s656_s8 = inlined_call_operand.vmem [shape: f32[1,5], index: 8, kind: input, shape index: {}]   ;;  %s657_s9 = inlined_call_operand.vmem [shape: f32[1,5], index: 9, kind: input, shape index: {}]   ;;  %s658_s10 = inlined_call_operand.vmem [shape: f32[1,5], index: 10, kind: input, shape index: {}]   ;;  %s659_s11 = inlined_call_operand.hbm [shape: f32[8,5], index: 11, kind: output, shape index: {}]  }
   0x1   :  { %17 = vsyncpa [#allocation6], 0 }
   0x2   :  { %18 = vsyncpa [#allocation4], 0  ;;  %s523_s17 = smov [#allocation5]  }
   0x3   :  { %s36_s18 = sshll.u32 %s523_s17, 4  ;;  %s37_s18 = int_to_ptr.vmem [resolvable:$true] %s36_s18 }
   0x4   :  { %s445_s19 = scalar_lea.vmem %s37_s18, 128  ;;  %p450_p1 = scmp.lt.s32.totalorder %s37_s18, %s37_s18 }
   0x5   :  { %p446_p0 = scmp.ne.s32.totalorder %s37_s18, %s445_s19  ;;  %p451_p2 = scmp.lt.s32.totalorder %s445_s19, %s445_s19 }
   0x7   :  { %p452_p3 = por %p451_p2, %p450_p1 }
   0x9   :  { %p453_p4 = pnand %p452_p3, %p446_p0 }
   0xb   :  { %456 = shalt.err (!%p453_p4)
}
   0xc   :  { %s524_s20 = smov 64   ;;  %s525_s21 = smov 4  }
   0xd   :  { %42 = dma.hbm_to_vmem [thread:$0]  %s650_s2, 128, %s37_s18, [#allocation6], %s524_s20, %s524_s20, %s525_s21  }
   0xe   :  { %s526_s24 = smov [#allocation2]   ;;  %s527_s26 = smov [#allocation7]  }
   0xf   :  { %s25_s25 = sshll.u32 %s526_s24, 4  ;;  %s53_s27 = sshll.u32 %s527_s26, 4  ;;  %s26_s25 = int_to_ptr.vmem [resolvable:$true] %s25_s25  ;;  %s54_s27 = int_to_ptr.vmem [resolvable:$true] %s53_s27 }
  0x10   :  { %s465_s28 = scalar_lea.vmem %s26_s25, 64  ;;  %p470_p6 = scmp.lt.s32.totalorder %s26_s25, %s26_s25 }
  0x11   :  { %p466_p5 = scmp.ne.s32.totalorder %s26_s25, %s465_s28  ;;  %p471_p7 = scmp.lt.s32.totalorder %s465_s28, %s465_s28 }
  0x13   :  { %p472_p8 = por %p471_p7, %p470_p6 }
  0x15   :  { %p473_p9 = pnand %p472_p8, %p466_p5 }
  0x17   :  { %476 = shalt.err (!%p473_p9)
}
  0x18   :  { %28 = dma.hbm_to_vmem [thread:$0]  %s648_s0, 64, %s26_s25, [#allocation3]  }
  0x19   :  { %s485_s12 = scalar_lea.vmem %s54_s27, 16  ;;  %s489_s2 = scalar_lea.vmem %s54_s27, 32 }
  0x1a   :  { %p486_p10 = scmp.ne.s32.totalorder %s54_s27, %s485_s12  ;;  %p490_p11 = scmp.lt.s32.totalorder %s54_s27, %s54_s27 }
  0x1b   :  { %p491_p12 = scmp.lt.s32.totalorder %s489_s2, %s485_s12 }
  0x1d   :  { %p492_p13 = por %p491_p12, %p490_p11 }
  0x1f   :  { %p493_p0 = pnand %p492_p13, %p486_p10 }
  0x21   :  { %496 = shalt.err (!%p493_p0)
}
  0x22   :  { %56 = dma.hbm_to_vmem [thread:$0]  %s653_s5, 16, %s54_s27, [#allocation6]  }
  0x23   :  { %517 = dma.done.wait [#allocation3], 64  }
  0x24   :  { %518 = vsyncadd [#allocation3], 4294967232 }
  0x25   :  { %519 = dma.done.wait [#allocation6], 144  }
  0x26   :  { %520 = vsyncadd [#allocation6], 4294967152  ;;  %v528_v0 = vmov 0.0   ;;  %vm529_vm0 = vmmov 0   ;;  %v426_v1 = vld [vmem:[#allocation5] sm:$0xff]   ;;  %vm93_vm1 = vcmask 130048   ;;  %v334_v35 = vlaneseq }
  0x27   :  { %387 = vmatprep.subr.bf16.mxu0 %v528_v0  ;;  %389 = vmatprep.mubr.msk.bf16.mxu0 %vm529_vm0, %v528_v0  ;;  %v77_v2 = vld [vmem:[#allocation2] sm:$0xf]  ;;  %v427_v3 = vld [vmem:[%s652_s4 + $0x18] sm:$0xff]   ;;  %v428_v4 = vld [vmem:[%s652_s4 + $0x10] sm:$0xff]   ;;  %vm180_vm3 = vcmask 523264   ;;  %v530_v42 = vmov 0  }
  0x28   :  { %393 = vmatprep.subr.bf16.mxu1 %v528_v0  ;;  %401 = vmatprep.mubr.msk.bf16.mxu1 %vm529_vm0, %v528_v0  ;;  %v429_v5 = vld [vmem:[%s652_s4 + $0x8] sm:$0xff]   ;;  %v430_v6 = vld [vmem:[%s652_s4] sm:$0xff]   ;;  %v431_v7 = vld [vmem:[%s654_s6 + $0x18] sm:$0xff]   ;;  %v335_v37 = vshrl.u32 %v334_v35, 7  ;;  %s531_s15 = smov [#allocation8]   ;;  %vm340_vm7 = vcmask 39936  }
  0x29   :  { %388 = vmatpush3.bf16.msra.mxu0 %v426_v1  ;;  %394 = vmatpush3.bf16.msra.mxu1 %v427_v3  ;;  %v432_v8 = vld [vmem:[%s654_s6 + $0x10] sm:$0xff]   ;;  %v358_v9 = vld [vmem:[%s651_s3] ss:$0 sm:$0xff]  ;;  %v433_v18 = vld [vmem:[%s654_s6 + $0x8] sm:$0xff]  }
  0x2a   :  { %405 = vmatprep.subr.bf16.mxu0 %v528_v0  ;;  %395 = vmatprep.subr.bf16.mxu1 %v528_v0  ;;  %v434_v19 = vld [vmem:[%s654_s6] sm:$0xff]   ;;  %v361_v20 = vld [vmem:[#allocation7] ss:$0 sm:$0xff]  ;;  %v336_v40 = vsub.s32 0, %v335_v37 }
  0x2b   :  { %v367_v29 = vld [vmem:[%s655_s7] ss:$0 sm:$0xff] }
  0x2c   :  { %390 = vmatmul.mubr.msk.bf16.vlgmr.msra.gmra.mxu0 %vm93_vm1, %v77_v2  ;;  %v331_v36 = vld [vmem:[%s658_s10] sm:$0x1] }
  0x2d   :  { %413 = vmatprep.mubr.msk.bf16.mxu0 %vm529_vm0, %v528_v0  ;;  %396 = vmatpush3.bf16.msra.mxu1 %v428_v4  ;;  %v311_v38 = vld [vmem:[%s649_s1] sm:$0xff]  ;;  %vm332_vm5 = vcmp.gt.f32.partialorder %v331_v36, 0.5  ;;  %s348_s1 = sshll.u32 %s531_s15, 4  ;;  %s349_s1 = int_to_ptr.vmem [resolvable:$true] %s348_s1 }
  0x2e   :  { %397 = vmatprep.subr.bf16.mxu1 %v528_v0  ;;  %406 = vmatpush3.bf16.msra.mxu0 %v431_v7  ;;  %v333_v43 = vsel %vm332_vm5, 1, %v530_v42  ;;  %v373_v45 = vld [vmem:[%s656_s8] ss:$0 sm:$0xff]  ;;  %s497_s16 = scalar_lea.vmem %s349_s1, 128  ;;  %p502_p2 = scmp.lt.s32.totalorder %s349_s1, %s349_s1 }
  0x2f   :  { %407 = vmatprep.subr.bf16.mxu0 %v528_v0  ;;  %v337_v46 = vrot.slane %v333_v43, %v336_v40  ;;  %v374_v48 = vld [vmem:[%s657_s9] ss:$0 sm:$0xff]  ;;  %p498_p1 = scmp.ne.s32.totalorder %s349_s1, %s497_s16  ;;  %p503_p3 = scmp.lt.s32.totalorder %s497_s16, %s497_s16 }
  0x31   :  { %398 = vmatpush3.bf16.msra.mxu1 %v429_v5  ;;  %vm338_vm6 = vcmp.eq.s32.totalorder %v337_v46, 1  ;;  %p504_p4 = por %p503_p3, %p502_p2 }
  0x32   :  { %399 = vmatprep.subr.bf16.mxu1 %v528_v0  ;;  %408 = vmatpush3.bf16.msra.mxu0 %v432_v8 }
  0x33   :  { %409 = vmatprep.subr.bf16.mxu0 %v528_v0  ;;  %p505_p5 = pnand %p504_p4, %p498_p1 }
  0x35   :  { %400 = vmatpush3.bf16.msra.mxu1 %v430_v6 }
  0x36   :  { %410 = vmatpush3.bf16.msra.mxu0 %v433_v18 }
  0x37   :  { %411 = vmatprep.subr.bf16.mxu0 %v528_v0 }
  0x3a   :  { %412 = vmatpush3.bf16.msra.mxu0 %v434_v19 }
  0xec   :  { %v131_v10 = vpop.f32.mrf.mxu0 }
  0xed   :  { %v132_v11 = vadd.f32 %v358_v9, %v131_v10 }
  0xee   :  { %v391_v12 = vpop.f32.mrf.mxu0 }
  0xef   :  { %vm137_vm2 = vcmp.gt.f32.partialorder %v132_v11, 0.0  ;;  %v138_v13 = vmul.f32 0.01, %v132_v11 }
  0xf0   :  { %v134_v14 = vpop.f32.mrf.mxu0 }
  0xf1   :  { %v139_v15 = vsel %vm137_vm2, %v132_v11, %v138_v13 }
  0xf2   :  { %v140_v16 = vpack.c.bf16 %v139_v15, %v139_v15  ;;  %v392_v17 = vpop.f32.mrf.mxu0 }
  0xf4   :  { %402 = vmatmul.mubr.msk.bf16.vlgmr.msra.gmra.mxu1 %vm180_vm3, %v140_v16 }
 0x1b4   :  { %v218_v21 = vpop.f32.mrf.mxu1 }
 0x1b5   :  { %v219_v22 = vadd.f32 %v361_v20, %v218_v21 }
 0x1b6   :  { %v403_v23 = vpop.f32.mrf.mxu1 }
 0x1b7   :  { %vm224_vm4 = vcmp.gt.f32.partialorder %v219_v22, 0.0  ;;  %v225_v24 = vmul.f32 0.01, %v219_v22 }
 0x1b8   :  { %v221_v25 = vpop.f32.mrf.mxu1 }
 0x1b9   :  { %v226_v26 = vsel %vm224_vm4, %v219_v22, %v225_v24 }
 0x1ba   :  { %v227_v27 = vpack.c.bf16 %v226_v26, %v226_v26  ;;  %v404_v28 = vpop.f32.mrf.mxu1 }
 0x1bc   :  { %414 = vmatmul.mubr.msk.bf16.vlgmr.msra.gmra.mxu0 %vm180_vm3, %v227_v27 }
 0x27c   :  { %v304_v30 = vpop.f32.mrf.mxu0 }
 0x27d   :  { %v305_v31 = vadd.f32 %v367_v29, %v304_v30 }
 0x27e   :  { %v415_v32 = vpop.f32.mrf.mxu0 }
 0x27f   :  { %435 = vtanh.f32 %v305_v31 }
 0x280   :  { %v307_v33 = vpop.f32.mrf.mxu0 }
 0x282   :  { %v416_v34 = vpop.f32.mrf.mxu0 }
 0x28c   :  { %v436_v39 = vpop.eup %435 }
 0x28d   :  { %v312_v41 = vsub.f32 %v311_v38, %v436_v39 }
 0x28f   :  { %v313_v44 = vmul.f32 %v312_v41, %v312_v41 }
 0x291   :  { %v314_v47 = vsub.f32 0.0, %v313_v44 }
 0x293   :  { %v322_v49 = vmul.f32 %v373_v45, %v314_v47 }
 0x295   :  { %v330_v50 = vadd.f32 %v374_v48, %v322_v49 }
 0x297   :  { %v339_v51 = vsel %vm338_vm6, %v330_v50, %v305_v31 }
 0x298   :  { %341 = vst.msk [vmem:[#allocation8] sm:$0xff] %vm340_vm7, %v339_v51 }
 0x299   :  { %508 = shalt.err (!%p505_p5)
}
 0x29a   :  { %351 = dma.vmem_to_hbm [thread:$0]  %s349_s1, 128, %s659_s11, [#allocation4]  }
 0x29b   :  { %521 = dma.done.wait [#allocation4], 128  }
 0x29c   :  { %522 = vsyncadd [#allocation4], 4294967168 }
 0x29d   :  { %355 = vsyncpa [#allocation3], 1 }
 0x29e   :  { %356 = vsyncpa [#allocation6], 1 }
 0x29f   :  { %357 = vsyncpa [#allocation4], 1 }

</bundles_post_ra>
